<compile_context>
chip_gen: v5e
topology: v5e:2x2
jax: 0.10.0
libtpu: 0.0.40
codegen_flags: <defaults>
</compile_context>

<pallas_src>
import math
import functools

import jax
import jax.numpy as jnp
from jax import lax
from jax.experimental import pallas as pl
from jax.experimental.pallas import tpu as pltpu


# ----------------------------------------------------------------------------
# Helpers
# ----------------------------------------------------------------------------
def _round_up(a, b):
    return ((a + b - 1) // b) * b


def _cdiv(a, b):
    return (a + b - 1) // b


def _device_kind():
    try:
        return jax.devices()[0].device_kind.lower()
    except Exception:  # pragma: no cover - defensive
        return ""


def _vmem_limit_bytes(kind):
    """Scoped-VMEM budget with headroom, derived from the chip when possible."""
    cap = None
    try:
        cap = int(pltpu.get_tpu_info().vmem_capacity_bytes)
    except Exception:  # pragma: no cover - defensive
        cap = None
    if cap is None:
        cap = (64 << 20) if "v7" in kind else (128 << 20)
    # Leave ~40% headroom for compiler-internal scratch; never below default.
    return int(min(64 << 20, max(32 << 20, cap * 3 // 5)))


def _pick_tk(k_pad, max_tk=1024):
    """Largest multiple of 128 that divides k_pad and is <= max_tk."""
    q = k_pad // 128
    for d in range(min(q, max_tk // 128), 0, -1):
        if q % d == 0:
            return 128 * d
    return 128


def _pick_tiles(m, n, k_pad, kind):
    """Generation-aware MXU-aligned tile sizes, clamped to the problem size."""
    is_v5e = ("v5 lite" in kind) or ("v5lite" in kind) or ("v5e" in kind)
    is_v7 = "v7" in kind
    if is_v5e:
        tm_pref, tn_pref = 256, 512      # 16 MiB scoped default: ~8 MiB blocks
    else:
        tm_pref, tn_pref = 512, 512      # v6e / v7x: ~11 MiB double-buffered
    tm = min(tm_pref, _round_up(m, 8))
    tn = min(tn_pref, _round_up(n, 128))
    tk = _pick_tk(k_pad, max_tk=1024)

    if is_v7:
        # 2 TensorCores per chip: make sure there are >= 2 parallel (i,j) tiles
        # whenever the problem allows it.
        if _cdiv(m, tm) * _cdiv(n, tn) < 2:
            tn_half = _round_up(max(_cdiv(n, 2), 1), 128)
            tm_half = _round_up(max(_cdiv(m, 2), 1), 8)
            if tn_half < tn and _cdiv(n, tn_half) >= 2:
                tn = tn_half
            elif tm_half < tm and _cdiv(m, tm_half) >= 2:
                tm = tm_half
    return tm, tn, tk


# ----------------------------------------------------------------------------
# Kernels
# ----------------------------------------------------------------------------
def _mask_k_tail(x, k_rem):
    """Zero the K-tail columns of the x tile on the last reduction step.

    The packed weight's K-tail rows are exact zeros, so masking x makes every
    tail product exactly 0 (garbage * 0 could otherwise be NaN)."""
    if k_rem is None:
        return x
    lane = lax.broadcasted_iota(jnp.int32, x.shape, 1)
    valid = jnp.where(pl.program_id(2) == pl.num_programs(2) - 1,
                      k_rem, x.shape[1])
    return jnp.where(lane < valid, x, jnp.zeros_like(x))


def _linear_kernel_f32(x_ref, w_ref, b_ref, o_ref, *, k_rem):
    """f32 output: accumulate directly into the resident output block."""
    k = pl.program_id(2)

    @pl.when(k == 0)
    def _():
        o_ref[...] = jnp.broadcast_to(b_ref[...], o_ref.shape)

    x = _mask_k_tail(x_ref[...], k_rem)
    o_ref[...] += jnp.dot(x, w_ref[...], preferred_element_type=jnp.float32)


def _linear_kernel_acc(x_ref, w_ref, b_ref, o_ref, acc_ref, *, k_rem):
    """Non-f32 output: f32 VMEM accumulator + finalize cast."""
    k = pl.program_id(2)

    @pl.when(k == 0)
    def _():
        acc_ref[...] = jnp.broadcast_to(b_ref[...], acc_ref.shape)

    x = _mask_k_tail(x_ref[...], k_rem)
    acc_ref[...] += jnp.dot(x, w_ref[...], preferred_element_type=jnp.float32)

    @pl.when(k == pl.num_programs(2) - 1)
    def _():
        o_ref[...] = acc_ref[...].astype(o_ref.dtype)


# ----------------------------------------------------------------------------
# Weight packing (one-time, amortized over every forward call)
# ----------------------------------------------------------------------------
def pack_linear_weight(weight):
    """Repack a PyTorch-layout (out_features, in_features) weight into the
    MXU-native (K, N) = (in_features, out_features) layout, zero-padding K to
    a multiple of 128. Do this once at parameter-init time."""
    n_out, k_in = weight.shape
    k_pad = _round_up(k_in, 128)
    w_kn = jnp.transpose(weight)                       # (K, N)
    if k_pad != k_in:
        w_kn = jnp.pad(w_kn, ((0, k_pad - k_in), (0, 0)))
    return w_kn


# ----------------------------------------------------------------------------
# Forward wrapper
# ----------------------------------------------------------------------------
@jax.jit
def linear_forward(x, w_kn, bias=None):
    """Equivalent of torch.matmul(x, weight.t()) (+ bias).

    x:    (..., in_features)
    w_kn: packed weight from pack_linear_weight, shape (k_pad, out_features)
          with k_pad = round_up(in_features, 128) and zero-padded K tail.
    bias: (out_features,) or None
    """
    out_dtype = x.dtype
    k_pad, n_out = w_kn.shape
    k_in = x.shape[-1]
    lead_shape = x.shape[:-1]
    m = 1
    for d in lead_shape:
        m *= d

    if m == 0:
        return jnp.zeros((*lead_shape, n_out), dtype=out_dtype)

    x2d = x.reshape(m, k_in)

    kind = _device_kind()
    tm, tn, tk = _pick_tiles(m, n_out, k_pad, kind)
    grid = (_cdiv(m, tm), _cdiv(n_out, tn), k_pad // tk)

    # K-tail masking is only needed when in_features is not lane aligned
    # (the x block then overhangs K while the packed weight has exact zeros).
    nk = grid[2]
    k_rem = None if k_in == k_pad else int(k_in - (nk - 1) * tk)

    # Bias in f32 (accumulator dtype); zeros when the module has no bias.
    if bias is not None:
        b2d = bias.astype(jnp.float32).reshape(1, n_out)
    else:
        b2d = jnp.zeros((1, n_out), jnp.float32)

    flops = 2 * m * k_in * n_out + m * n_out
    bytes_accessed = (x2d.size * x2d.dtype.itemsize
                      + w_kn.size * w_kn.dtype.itemsize
                      + b2d.size * 4
                      + m * n_out * jnp.dtype(out_dtype).itemsize)
    cost = pl.CostEstimate(flops=int(flops), transcendentals=0,
                           bytes_accessed=int(bytes_accessed))

    x_spec = pl.BlockSpec((tm, tk), lambda i, j, k: (i, k))
    w_spec = pl.BlockSpec((tk, tn), lambda i, j, k: (k, j))
    b_spec = pl.BlockSpec((1, tn), lambda i, j, k: (0, j))
    o_spec = pl.BlockSpec((tm, tn), lambda i, j, k: (i, j))
    out_shape = jax.ShapeDtypeStruct((m, n_out), out_dtype)

    compiler_params = pltpu.CompilerParams(
        dimension_semantics=("parallel", "parallel", "arbitrary"),
        vmem_limit_bytes=_vmem_limit_bytes(kind))

    if jnp.dtype(out_dtype) == jnp.float32:
        kernel = functools.partial(_linear_kernel_f32, k_rem=k_rem)
        scratch = []
    else:
        kernel = functools.partial(_linear_kernel_acc, k_rem=k_rem)
        scratch = [pltpu.VMEM((tm, tn), jnp.float32)]

    out2d = pl.pallas_call(
        kernel,
        out_shape=out_shape,
        grid_spec=pltpu.PrefetchScalarGridSpec(
            num_scalar_prefetch=0,
            grid=grid,
            in_specs=[x_spec, w_spec, b_spec],
            out_specs=o_spec,
            scratch_shapes=scratch),
        compiler_params=compiler_params,
        cost_estimate=cost,
    )(x2d, w_kn, b2d)

    return out2d.reshape(*lead_shape, n_out)


# ----------------------------------------------------------------------------
# Parameter init mirroring nn.Linear.reset_parameters
# ----------------------------------------------------------------------------
def init_linear_params(key, in_features, out_features, bias=True,
                       dtype=jnp.float32):
    """kaiming_uniform_(a=sqrt(5)) => U(-1/sqrt(fan_in), 1/sqrt(fan_in)) for
    weight; bias ~ U(-1/sqrt(fan_in), 1/sqrt(fan_in))."""
    kw, kb = jax.random.split(key)
    fan_in = in_features
    w_bound = math.sqrt(6.0 / ((1.0 + 5.0) * fan_in))  # = 1/sqrt(fan_in)
    weight = jax.random.uniform(
        kw, (out_features, in_features), dtype, minval=-w_bound, maxval=w_bound)
    if bias:
        b_bound = 1.0 / math.sqrt(fan_in)
        b = jax.random.uniform(
            kb, (out_features,), dtype, minval=-b_bound, maxval=b_bound)
    else:
        b = None
    return weight, b


if __name__ == "__main__":
    key = jax.random.PRNGKey(0)
    k_x, k_p, k_x2, k_p2 = jax.random.split(key, 4)

    # Test 1: module-sized shapes with bias (batch=2, seq=8, hidden 32 -> 64).
    batch, seq, in_features, out_features = 2, 8, 32, 64
    x = jax.random.normal(k_x, (batch, seq, in_features), jnp.float32)
    weight, bias = init_linear_params(k_p, in_features, out_features, bias=True)
    w_kn = pack_linear_weight(weight)          # one-time repack at "init"

    out = jax.block_until_ready(linear_forward(x, w_kn, bias))
    ref = jnp.matmul(x, weight.T) + bias
    assert out.shape == (batch, seq, out_features)
    assert jnp.allclose(out, ref, atol=1e-5, rtol=1e-5)

    # Test 2: no bias, unaligned shapes exercising the in-kernel K-tail mask
    # and partial (overhanging) M/N edge blocks.
    m2, in2, out2 = 70, 200, 300
    x2 = jax.random.normal(k_x2, (m2, in2), jnp.float32)
    w2, _ = init_linear_params(k_p2, in2, out2, bias=False)
    w2_kn = pack_linear_weight(w2)

    y2 = jax.block_until_ready(linear_forward(x2, w2_kn, None))
    ref2 = jnp.matmul(x2, w2.T)
    assert y2.shape == (m2, out2)
    assert jnp.allclose(y2, ref2, atol=1e-4, rtol=1e-4)

    print("KERNEL_OK")
</pallas_src>

<mosaic_0001>
module attributes {stable_mosaic.version = 11 : i64} {
  func.func @_linear_kernel_f32(%arg0: i32, %arg1: i32, %arg2: i32, %arg3: memref<16x128xf32, #tpu.memory_space<vmem>>, %arg4: memref<128x128xf32, #tpu.memory_space<vmem>>, %arg5: memref<1x128xf32, #tpu.memory_space<vmem>>, %arg6: memref<16x128xf32, #tpu.memory_space<vmem>>) attributes {dimension_semantics = [#tpu.dimension_semantics<parallel>, #tpu.dimension_semantics<parallel>, #tpu.dimension_semantics<arbitrary>], iteration_bounds = array<i64: 1, 1, 1>, scalar_prefetch = 0 : i64, scratch_operands = 0 : i64, tpu.core_type = #tpu.core_type<tc>, window_params = [{transform_indices = @transform_0, window_bounds = array<i64: 16, 128>}, {transform_indices = @transform_1, window_bounds = array<i64: 128, 128>}, {transform_indices = @transform_2, window_bounds = array<i64: 1, 128>}, {transform_indices = @transform_3, window_bounds = array<i64: 16, 128>}]} {
    %c0_i32 = arith.constant 0 : i32
    %0 = arith.cmpi eq, %arg2, %c0_i32 : i32
    %1 = arith.extui %0 : i1 to i32
    %c0_i32_0 = arith.constant 0 : i32
    %2 = arith.cmpi ne, %1, %c0_i32_0 : i32
    scf.if %2 {
      %c0_10 = arith.constant 0 : index
      %c0_11 = arith.constant 0 : index
      %16 = vector.load %arg5[%c0_10, %c0_11] : memref<1x128xf32, #tpu.memory_space<vmem>>, vector<1x128xf32>
      %17 = vector.shape_cast %16 : vector<1x128xf32> to vector<1x128xf32>
      %18 = vector.broadcast %17 : vector<1x128xf32> to vector<16x128xf32>
      %c0_12 = arith.constant 0 : index
      %c0_13 = arith.constant 0 : index
      %19 = vector.load %arg6[%c0_12, %c0_13] : memref<16x128xf32, #tpu.memory_space<vmem>>, vector<16x128xf32>
      tpu.vector_store %arg6[%c0_12, %c0_13], %18 {strides = array<i32>} : memref<16x128xf32, #tpu.memory_space<vmem>>, vector<16x128xf32>,
    } else {
    }
    %c0 = arith.constant 0 : index
    %c0_1 = arith.constant 0 : index
    %3 = vector.load %arg3[%c0, %c0_1] : memref<16x128xf32, #tpu.memory_space<vmem>>, vector<16x128xf32>
    %4 = tpu.iota {dimensions = array<i32: 1>} : vector<16x128xi32>
    %c0_i32_2 = arith.constant 0 : i32
    %5 = arith.cmpi eq, %arg2, %c0_i32_2 : i32
    %c32_i32 = arith.constant 32 : i32
    %c128_i32 = arith.constant 128 : i32
    %6 = arith.select %5, %c32_i32, %c128_i32 : i32
    %7 = vector.broadcast %6 : i32 to vector<16x128xi32>
    %8 = arith.cmpi slt, %4, %7 : vector<16x128xi32>
    %cst = arith.constant 0.000000e+00 : f32
    %9 = vector.broadcast %cst : f32 to vector<16x128xf32>
    %10 = arith.select %8, %3, %9 : vector<16x128xi1>, vector<16x128xf32>
    %c0_3 = arith.constant 0 : index
    %c0_4 = arith.constant 0 : index
    %11 = vector.load %arg6[%c0_3, %c0_4] : memref<16x128xf32, #tpu.memory_space<vmem>>, vector<16x128xf32>
    %c0_5 = arith.constant 0 : index
    %c0_6 = arith.constant 0 : index
    %12 = vector.load %arg4[%c0_5, %c0_6] : memref<128x128xf32, #tpu.memory_space<vmem>>, vector<128x128xf32>
    %cst_7 = arith.constant dense<0.000000e+00> : vector<16x128xf32>
    %13 = tpu.matmul %10, %12, %cst_7 {dimension_numbers = #tpu.dot_dimension_numbers<[1], [0], [0], [1], [0, 0, 1, 1], [], []>} : vector<16x128xf32>, vector<128x128xf32>, vector<16x128xf32> -> vector<16x128xf32>
    %14 = arith.addf %11, %13 : vector<16x128xf32>
    %c0_8 = arith.constant 0 : index
    %c0_9 = arith.constant 0 : index
    %15 = vector.load %arg6[%c0_8, %c0_9] : memref<16x128xf32, #tpu.memory_space<vmem>>, vector<16x128xf32>
    tpu.vector_store %arg6[%c0_8, %c0_9], %14 {strides = array<i32>} : memref<16x128xf32, #tpu.memory_space<vmem>>, vector<16x128xf32>,
    return
  }
  func.func @transform_0(%arg0: i32, %arg1: i32, %arg2: i32) -> (i32, i32) {
    %c0_i32 = arith.constant 0 : i32
    return %arg0, %arg2 : i32, i32
  }
  func.func @transform_1(%arg0: i32, %arg1: i32, %arg2: i32) -> (i32, i32) {
    %c0_i32 = arith.constant 0 : i32
    return %arg2, %arg1 : i32, i32
  }
  func.func @transform_2(%arg0: i32, %arg1: i32, %arg2: i32) -> (i32, i32) {
    %c0_i32 = arith.constant 0 : i32
    %c0_i32_0 = arith.constant 0 : i32
    return %c0_i32, %arg1 : i32, i32
  }
  func.func @transform_3(%arg0: i32, %arg1: i32, %arg2: i32) -> (i32, i32) {
    %c0_i32 = arith.constant 0 : i32
    return %arg0, %arg1 : i32, i32
  }
}

</mosaic_0001>

<bundles_post_ra>
// kernel: linear_forward.1
= control target key start
LH: loop header
LB: loop body
LE: loop exit
PB: predicated region body
PF: predicated region fallthrough
CT: control target
= control target key end

     0   :  { %s228_s0 = inlined_call_operand.vmem [shape: f32[16,32], index: 0, kind: input, shape index: {}]   ;;  %s229_s1 = inlined_call_operand.vmem [shape: f32[128,64], index: 1, kind: input, shape index: {}]   ;;  %s230_s2 = inlined_call_operand.vmem [shape: f32[1,64], index: 2, kind: input, shape index: {}]   ;;  %s231_s3 = inlined_call_operand.hbm [shape: f32[16,64], index: 3, kind: output, shape index: {}]  }
   0x1   :  { %v51_v0 = vld [vmem:[%s229_s1 + $0x78] sm:$0xff]  ;;  %v50_v1 = vld [vmem:[%s229_s1 + $0x70] sm:$0xff]  ;;  %v49_v2 = vld [vmem:[%s229_s1 + $0x68] sm:$0xff] }
   0x2   :  { %52 = vmatpush.msra.mxu0 %v51_v0  ;;  %99 = vmatpush.msra.mxu1 %v51_v0  ;;  %v48_v3 = vld [vmem:[%s229_s1 + $0x60] sm:$0xff]  ;;  %v47_v4 = vld [vmem:[%s229_s1 + $0x58] sm:$0xff] }
   0x4   :  { %53 = vmatpush.msra.mxu0 %v50_v1  ;;  %100 = vmatpush.msra.mxu1 %v50_v1 }
   0x6   :  { %54 = vmatpush.msra.mxu0 %v49_v2  ;;  %101 = vmatpush.msra.mxu1 %v49_v2 }
   0x7   :  { %8 = vsyncpa [#allocation3], 0  ;;  %v46_v5 = vld [vmem:[%s229_s1 + $0x50] sm:$0xff]  ;;  %v45_v6 = vld [vmem:[%s229_s1 + $0x48] sm:$0xff]  ;;  %v27_v12 = vlaneseq  ;;  %s85_s26 = sshll.u32 %s231_s3, 4  ;;  %s147_s27 = smov 8   ;;  %s86_s26 = int_to_ptr.hbm [resolvable:$true] %s85_s26 }
   0x8   :  { %55 = vmatpush.msra.mxu0 %v48_v3  ;;  %102 = vmatpush.msra.mxu1 %v48_v3  ;;  %v44_v7 = vld [vmem:[%s229_s1 + $0x40] sm:$0xff]  ;;  %v43_v8 = vld [vmem:[%s229_s1 + $0x38] sm:$0xff]  ;;  %v42_v9 = vld [vmem:[%s229_s1 + $0x30] sm:$0xff] }
   0x9   :  { %v41_v10 = vld [vmem:[%s229_s1 + $0x28] sm:$0xff]  ;;  %v40_v11 = vld [vmem:[%s229_s1 + $0x20] sm:$0xff]  ;;  %v39_v13 = vld [vmem:[%s229_s1 + $0x18] sm:$0xff]  ;;  %v28_v15 = vand.u32 127, %v27_v12 }
   0xa   :  { %56 = vmatpush.msra.mxu0 %v47_v4  ;;  %103 = vmatpush.msra.mxu1 %v47_v4  ;;  %v38_v14 = vld [vmem:[%s229_s1 + $0x10] sm:$0xff]  ;;  %v37_v16 = vld [vmem:[%s229_s1 + $0x8] sm:$0xff]  ;;  %v36_v17 = vld [vmem:[%s229_s1] sm:$0xff]  ;;  %s145_s1 = smov [#allocation2]  }
   0xb   :  { %v25_v18 = vld [vmem:[%s228_s0] sm:$0xff]  ;;  %vm31_vm0 = vcmp.lt.s32.totalorder %v28_v15, 32  ;;  %v26_v19 = vld [vmem:[%s228_s0 + $0x8] sm:$0xff]  ;;  %s83_s23 = sshll.u32 %s145_s1, 4  ;;  %s146_s0 = smov 128   ;;  %s84_s23 = int_to_ptr.vmem [resolvable:$true] %s83_s23 }
   0xc   :  { %57 = vmatpush.msra.mxu0 %v46_v5  ;;  %104 = vmatpush.msra.mxu1 %v46_v5  ;;  %v118_v20 = vld [vmem:[%s230_s2] ss:$0 sm:$0xff] }
   0xe   :  { %58 = vmatpush.msra.mxu0 %v45_v6  ;;  %105 = vmatpush.msra.mxu1 %v45_v6 }
  0x10   :  { %59 = vmatpush.msra.mxu0 %v44_v7  ;;  %106 = vmatpush.msra.mxu1 %v44_v7 }
  0x12   :  { %60 = vmatpush.msra.mxu0 %v43_v8  ;;  %107 = vmatpush.msra.mxu1 %v43_v8 }
  0x14   :  { %61 = vmatpush.msra.mxu0 %v42_v9  ;;  %108 = vmatpush.msra.mxu1 %v42_v9 }
  0x16   :  { %62 = vmatpush.msra.mxu0 %v41_v10  ;;  %109 = vmatpush.msra.mxu1 %v41_v10 }
  0x18   :  { %63 = vmatpush.msra.mxu0 %v40_v11  ;;  %110 = vmatpush.msra.mxu1 %v40_v11 }
  0x1a   :  { %64 = vmatpush.msra.mxu0 %v39_v13  ;;  %111 = vmatpush.msra.mxu1 %v39_v13 }
  0x1c   :  { %65 = vmatpush.msra.mxu0 %v38_v14  ;;  %112 = vmatpush.msra.mxu1 %v38_v14 }
  0x1e   :  { %66 = vmatpush.msra.mxu0 %v37_v16  ;;  %113 = vmatpush.msra.mxu1 %v37_v16 }
  0x20   :  { %67 = vmatpush.msra.mxu0 %v36_v17  ;;  %114 = vmatpush.msra.mxu1 %v36_v17 }
  0x21   :  { %97 = vmatmul.msk.f32.vlgmr.msra.gmra.mxu0 %vm31_vm0, %v25_v18  ;;  %98 = vmatmul.msk.f32.vlgmr.msra.gmra.mxu1 %vm31_vm0, %v26_v19 }
  0x9e   :  { %v69_v21 = vpop.f32.mrf.mxu0  ;;  %v72_v22 = vpop.f32.mrf.mxu1 }
  0x9f   :  { %v75_v23 = vadd.f32 %v118_v20, %v69_v21  ;;  %v76_v24 = vadd.f32 %v118_v20, %v72_v22 }
  0xa1   :  { %77 = vst [vmem:[#allocation2] sm:$0xff] %v75_v23 }
  0xa2   :  { %78 = vst [vmem:[#allocation2 + $0x8] sm:$0xff] %v76_v24 }
  0xa3   :  { %91 = dma.vmem_to_hbm [thread:$0]  %s84_s23, 256, %s86_s26, [#allocation3], %s146_s0, %s146_s0, %s147_s27  }
  0xa4   :  { %143 = dma.done.wait [#allocation3], 256  }
  0xa5   :  { %144 = vsyncadd [#allocation3], 4294967040 }
  0xa6   :  { %96 = vsyncpa [#allocation3], 1 }

</bundles_post_ra>
